<compile_context>
chip_gen: v7x
topology: tpu7x:2x2x1
jax: 0.10.0
libtpu: 0.0.40
codegen_flags: <defaults>
</compile_context>

<pallas_src>
import functools

import jax
import jax.numpy as jnp
from jax.experimental import pallas as pl
from jax.experimental.pallas import tpu as pltpu


_MATMUL_VMEM_LIMIT = 48 * 1024 * 1024   # <= v7x's 64 MiB physical VMEM
_EWISE_VMEM_LIMIT = 32 * 1024 * 1024


# ------------------------------ tiling helpers ------------------------------

def _round_up(x, m):
    return ((x + m - 1) // m) * m


def _pick_tile_m(m, target=256, align=128):
    """Row (M) tile: multiple of `align` (MXU / bf16-sublane friendly) that
    divides the padded M.  Returns (tile, padded_m)."""
    if m <= target:
        t = _round_up(m, align)
        return t, t
    padded = _round_up(m, align)
    best = None
    for cand in range(align, min(padded, 2 * target) + 1, align):
        if padded % cand == 0 and (best is None or
                                   abs(cand - target) < abs(best - target)):
            best = cand
    if best is not None:
        return best, padded
    return target, _round_up(m, target)


def _pick_div_tile(size, target):
    """Weight-dimension tile: an exact divisor of `size` that is a multiple of
    128 (so the pre-folded weights never need padding); small / odd sizes fall
    back to the full extent (allowed: full-extent blocks bypass (8,128))."""
    if size % 128 != 0:
        return size
    best = None
    for cand in range(128, size + 1, 128):
        if size % cand == 0 and cand <= 2 * target:
            if best is None or abs(cand - target) < abs(best - target):
                best = cand
    return best if best is not None else size


# ------------------------------ Pallas kernels ------------------------------

def _matmul_bias_kernel(x_ref, w_ref, b_ref, *rest, apply_relu, has_residual):
    """bf16 x bf16 -> f32 accumulate; fused bias (+ residual) (+ ReLU) on the
    last K step.  First K step writes the accumulator directly (no zero-init
    pass)."""
    if has_residual:
        r_ref, o_ref, acc_ref = rest
    else:
        o_ref, acc_ref = rest
        r_ref = None

    k = pl.program_id(2)
    d = jnp.dot(x_ref[...], w_ref[...], preferred_element_type=jnp.float32)

    @pl.when(k == 0)
    def _():
        acc_ref[...] = d

    @pl.when(k > 0)
    def _():
        acc_ref[...] += d

    @pl.when(k == pl.num_programs(2) - 1)
    def _():
        out = acc_ref[...] + b_ref[...]          # (1, tn) broadcast over rows
        if has_residual:
            out = out + r_ref[...].astype(jnp.float32)   # fused residual add
        if apply_relu:
            out = jnp.maximum(out, 0.0)
        o_ref[...] = out.astype(o_ref.dtype)


def matmul_bias(x, layer, *, relu, residual=None, out_dtype=jnp.bfloat16):
    """y = act(x @ w + b [+ residual]).  x:(M,K), w:(K,N) bf16 (BN folded),
    b:(1,N) f32, residual:(M,N).  bf16 MXU inputs, f32 accumulation."""
    w, b = layer["w"], layer["b"]
    tk, tn = layer["tk"], layer["tn"]
    M, K = x.shape
    Kw, Nout = w.shape
    assert K == Kw, (K, Kw)
    tm, Mp = _pick_tile_m(M)

    # v7x megacore: keep >=2 "parallel" output blocks so both TensorCores get
    # work; harmless (a few more grid steps) on single-TC v5e/v6e.
    if (Mp // tm) * (Nout // tn) < 2:
        if tn % 256 == 0:
            tn //= 2
        elif tm % 256 == 0:
            tm //= 2

    xb = x.astype(jnp.bfloat16)
    if Mp != M:
        xb = jnp.pad(xb, ((0, Mp - M), (0, 0)))

    inputs = [xb, w, b]
    in_specs = [pl.BlockSpec((tm, tk), lambda i, j, k: (i, k)),
                pl.BlockSpec((tk, tn), lambda i, j, k: (k, j)),
                pl.BlockSpec((1, tn), lambda i, j, k: (0, j))]
    has_res = residual is not None
    if has_res:
        rb = residual.astype(jnp.bfloat16)
        if Mp != M:
            rb = jnp.pad(rb, ((0, Mp - M), (0, 0)))
        inputs.append(rb)
        in_specs.append(pl.BlockSpec((tm, tn), lambda i, j, k: (i, j)))

    out = pl.pallas_call(
        functools.partial(_matmul_bias_kernel, apply_relu=relu,
                          has_residual=has_res),
        out_shape=jax.ShapeDtypeStruct((Mp, Nout), out_dtype),
        grid=(Mp // tm, Nout // tn, K // tk),
        in_specs=in_specs,
        out_specs=pl.BlockSpec((tm, tn), lambda i, j, k: (i, j)),
        scratch_shapes=[pltpu.VMEM((tm, tn), jnp.float32)],
        compiler_params=pltpu.CompilerParams(
            dimension_semantics=("parallel", "parallel", "arbitrary"),
            vmem_limit_bytes=_MATMUL_VMEM_LIMIT),
    )(*inputs)
    return out[:M] if Mp != M else out


def _direct3x3_kernel(x_ref, w_ref, b_ref, o_ref, acc_ref, *, offs, m_out,
                      apply_relu):
    """Direct 3x3 / stride-1 conv on one flattened, zero-padded image.

    x_ref: (rows, Cin) with Cin on lanes; tap (di, dj) is the constant row
    offset di*Wp + dj, so the conv is 9 shifted MXU dots accumulated into an
    f32 VMEM scratch - no im2col expansion ever touches HBM."""
    for t, off in enumerate(offs):
        d = jnp.dot(x_ref[pl.ds(off, m_out), :], w_ref[t],
                    preferred_element_type=jnp.float32)
        if t == 0:
            acc_ref[...] = d
        else:
            acc_ref[...] += d
    out = acc_ref[...] + b_ref[...]
    if apply_relu:
        out = jnp.maximum(out, 0.0)
    o_ref[...] = out.astype(o_ref.dtype)


def conv_bn_direct3x3(x, layer, *, relu=True):
    """3x3 / stride-1 / pad-1 conv + folded BN + optional ReLU without im2col.

    The (1,2)/(1,2) zero padding gives every tap slice an in-bounds window;
    output rows h*Wp + w with w < W are the valid conv outputs, the rest are
    discarded by the final slice."""
    N, H, W, Cin = x.shape
    O = layer["n"]
    Hp, Wp = H + 3, W + 3
    rows = Hp * Wp
    m_out = H * Wp
    offs = tuple(di * Wp + dj for di in range(3) for dj in range(3))

    xp = jnp.pad(x.astype(jnp.bfloat16), ((0, 0), (1, 2), (1, 2), (0, 0)))
    xflat = xp.reshape(N, rows, Cin)

    out = pl.pallas_call(
        functools.partial(_direct3x3_kernel, offs=offs, m_out=m_out,
                          apply_relu=relu),
        out_shape=jax.ShapeDtypeStruct((N, m_out, O), jnp.bfloat16),
        grid=(N,),
        in_specs=[pl.BlockSpec((None, rows, Cin), lambda n: (n, 0, 0)),
                  pl.BlockSpec((9, Cin, O), lambda n: (0, 0, 0)),
                  pl.BlockSpec((1, O), lambda n: (0, 0))],
        out_specs=pl.BlockSpec((None, m_out, O), lambda n: (n, 0, 0)),
        scratch_shapes=[pltpu.VMEM((m_out, O), jnp.float32)],
        compiler_params=pltpu.CompilerParams(
            dimension_semantics=("parallel",),
            vmem_limit_bytes=_MATMUL_VMEM_LIMIT),
    )(xflat, layer["w"], layer["b"])

    return out.reshape(N, H, Wp, O)[:, :, :W, :]


def _maxpool3x3_kernel(x_ref, o_ref, *, offs, m_out):
    r = x_ref[pl.ds(offs[0], m_out), :]
    for off in offs[1:]:
        r = jnp.maximum(r, x_ref[pl.ds(off, m_out), :])
    o_ref[...] = r


def maxpool2d_3x3_s2_p1(x):
    """3x3 / stride-2 / pad-1 maxpool.  A Pallas kernel computes the window
    max at every stride-1 position of one flattened padded image (9 constant
    row-offset slices, no (9, M, C) stack in HBM); the stride-2 subsample is
    then a cheap strided slice of the result."""
    N, H, W, C = x.shape
    Hout = (H - 1) // 2 + 1
    Wout = (W - 1) // 2 + 1
    Hp, Wp = H + 3, W + 3
    rows = Hp * Wp
    m_out = (2 * Hout - 1) * Wp
    offs = tuple(di * Wp + dj for di in range(3) for dj in range(3))

    neg = float(jnp.finfo(x.dtype).min)          # dtype-correct -inf surrogate
    xp = jnp.pad(x, ((0, 0), (1, 2), (1, 2), (0, 0)), constant_values=neg)
    xflat = xp.reshape(N, rows, C)

    y = pl.pallas_call(
        functools.partial(_maxpool3x3_kernel, offs=offs, m_out=m_out),
        out_shape=jax.ShapeDtypeStruct((N, m_out, C), x.dtype),
        grid=(N,),
        in_specs=[pl.BlockSpec((None, rows, C), lambda n: (n, 0, 0))],
        out_specs=pl.BlockSpec((None, m_out, C), lambda n: (n, 0, 0)),
        compiler_params=pltpu.CompilerParams(
            dimension_semantics=("parallel",),
            vmem_limit_bytes=_EWISE_VMEM_LIMIT),
    )(xflat)

    y = y.reshape(N, 2 * Hout - 1, Wp, C)
    return y[:, ::2, :2 * Wout - 1:2, :]


def _avgpool_kernel(x_ref, o_ref):
    o_ref[...] = jnp.mean(x_ref[...].astype(jnp.float32), axis=1)


def global_avgpool(x):
    """Mean over the spatial axis.  x:(N, HW, C) bf16 -> (N, C) f32.  Tiny."""
    N, HW, C = x.shape
    return pl.pallas_call(
        _avgpool_kernel,
        out_shape=jax.ShapeDtypeStruct((N, C), jnp.float32),
        grid=(1,),
        in_specs=[pl.BlockSpec((N, HW, C), lambda i: (0, 0, 0))],
        out_specs=pl.BlockSpec((N, C), lambda i: (0, 0)),
    )(x)


# ------------------------------ conv glue -----------------------------------

def conv_bn_matmul(x, layer, *, stride, padding, relu, residual=None,
                   out_dtype=jnp.bfloat16):
    """Conv2d (no bias) + folded BN (+ fused residual) + optional ReLU via the
    tiled Pallas matmul.  1x1 convs need no im2col copy (reshape / strided
    subsample only)."""
    N, H, W, Cin = x.shape
    kh, kw = layer["kh"], layer["kw"]
    O = layer["n"]
    Hout = (H + 2 * padding - kh) // stride + 1
    Wout = (W + 2 * padding - kw) // stride + 1

    xb = x.astype(jnp.bfloat16)
    if kh == 1 and kw == 1:
        if stride != 1:
            xb = xb[:, :Hout * stride:stride, :Wout * stride:stride, :]
        patches = xb.reshape(N * Hout * Wout, Cin)
    else:
        # TODO(synk): the 7x7 stem and the three stride-2 3x3 convs still
        # materialize a (bf16) im2col copy in HBM; a strided manual-DMA
        # direct-conv kernel would remove that remaining traffic.
        xp = jnp.pad(xb, ((0, 0), (padding, padding), (padding, padding),
                          (0, 0)))
        cols = [xp[:, i:i + Hout * stride:stride,
                   j:j + Wout * stride:stride, :]
                for i in range(kh) for j in range(kw)]
        patches = jnp.stack(cols, axis=3).reshape(N * Hout * Wout,
                                                  kh * kw * Cin)

    out = matmul_bias(patches, layer, relu=relu, residual=residual,
                      out_dtype=out_dtype)
    return out.reshape(N, Hout, Wout, O)


# -------------------------------- parameters --------------------------------

def init_conv(key, o, i, kh, kw):
    std = (2.0 / (i * kh * kw)) ** 0.5
    return std * jax.random.normal(key, (o, i, kh, kw), jnp.float32)


def init_bn(key, c):
    k1, k2, k3, k4 = jax.random.split(key, 4)
    gamma = 1.0 + 0.1 * jax.random.normal(k1, (c,), jnp.float32)
    beta = 0.1 * jax.random.normal(k2, (c,), jnp.float32)
    mean = 0.1 * jax.random.normal(k3, (c,), jnp.float32)
    var = 0.5 + jax.random.uniform(k4, (c,), jnp.float32)
    return (gamma, beta, mean, var)


def init_bottleneck(key, inplanes, planes, stride, downsample):
    ks = jax.random.split(key, 8)
    p = {
        "conv1": init_conv(ks[0], planes, inplanes, 1, 1),
        "bn1": init_bn(ks[1], planes),
        "conv2": init_conv(ks[2], planes, planes, 3, 3),
        "bn2": init_bn(ks[3], planes),
        "conv3": init_conv(ks[4], planes * 4, planes, 1, 1),
        "bn3": init_bn(ks[5], planes * 4),
        "stride": stride,
    }
    if downsample:
        p["dconv"] = init_conv(ks[6], planes * 4, inplanes, 1, 1)
        p["dbn"] = init_bn(ks[7], planes * 4)
    return p


def init_resnet50(key, hash_bit):
    # TODO(synk): torchvision pretrained weights replaced by deterministic init.
    keys = jax.random.split(key, 24)
    params = {"conv1": init_conv(keys[0], 64, 3, 7, 7),
              "bn1": init_bn(keys[1], 64)}
    inplanes = 64
    kidx = 2
    layers = []
    for planes, nblocks, stride in [(64, 3, 1), (128, 4, 2), (256, 6, 2),
                                    (512, 3, 2)]:
        blocks = []
        for bi in range(nblocks):
            s = stride if bi == 0 else 1
            downsample = (bi == 0) and (s != 1 or inplanes != planes * 4)
            blocks.append(init_bottleneck(keys[kidx], inplanes, planes, s,
                                          downsample))
            kidx += 1
            inplanes = planes * 4
        layers.append(blocks)
    params["layers"] = layers
    kw_, kb_ = jax.random.split(keys[kidx], 2)
    params["hash_w"] = 0.01 * jax.random.normal(kw_, (2048, hash_bit),
                                                jnp.float32)
    params["hash_b"] = jnp.zeros((hash_bit,), jnp.float32)   # fill_(0.0)
    return params


def _fold_bn(w, bn, eps=1e-5):
    gamma, beta, mean, var = bn
    scale = gamma / jnp.sqrt(var + eps)
    shift = beta - mean * scale
    return scale, shift


def _prep_matmul_conv(w, bn, *, tk_target=1024, tn_target=512):
    """Fold BN into a matmul-ready (kh*kw*Cin, O) bf16 weight + (1, O) shift
    and fix the K/N tiles once (exact divisors -> no per-call weight pads)."""
    scale, shift = _fold_bn(w, bn)
    O, Cin, kh, kw = w.shape
    wmat = jnp.transpose(w, (2, 3, 1, 0)).reshape(kh * kw * Cin, O)
    wmat = (wmat * scale[None, :]).astype(jnp.bfloat16)
    return {"kind": "matmul", "w": wmat,
            "b": shift.astype(jnp.float32).reshape(1, O),
            "kh": kh, "kw": kw, "n": O,
            "tk": _pick_div_tile(kh * kw * Cin, tk_target),
            "tn": _pick_div_tile(O, tn_target)}


def _prep_direct_conv(w, bn):
    """Fold BN into a (9, Cin, O) bf16 weight + (1, O) shift for the direct
    3x3 stride-1 kernel."""
    scale, shift = _fold_bn(w, bn)
    O, Cin, kh, kw = w.shape
    wt = jnp.transpose(w, (2, 3, 1, 0)).reshape(kh * kw, Cin, O)
    wt = (wt * scale[None, None, :]).astype(jnp.bfloat16)
    return {"kind": "direct3x3", "w": wt,
            "b": shift.astype(jnp.float32).reshape(1, O), "n": O}


def prepare_params(params):
    """One-time conversion: fold BN, reshape, cast to bf16, pick tiles."""
    prepped = {"stem": _prep_matmul_conv(params["conv1"], params["bn1"])}
    layers = []
    for blocks in params["layers"]:
        pblocks = []
        for p in blocks:
            stride = p["stride"]
            b = {"conv1": _prep_matmul_conv(p["conv1"], p["bn1"]),
                 "conv3": _prep_matmul_conv(p["conv3"], p["bn3"]),
                 "stride": stride}
            if stride == 1:
                b["conv2"] = _prep_direct_conv(p["conv2"], p["bn2"])
            else:
                b["conv2"] = _prep_matmul_conv(p["conv2"], p["bn2"])
            if "dconv" in p:
                b["dconv"] = _prep_matmul_conv(p["dconv"], p["dbn"])
            pblocks.append(b)
        layers.append(pblocks)
    prepped["layers"] = layers
    hash_bit = params["hash_w"].shape[1]
    prepped["hash"] = {"w": params["hash_w"].astype(jnp.bfloat16),
                       "b": params["hash_b"].astype(jnp.float32).reshape(1, -1),
                       "tk": _pick_div_tile(2048, 1024),
                       "tn": _pick_div_tile(hash_bit, 512)}
    return prepped


# ---------------------------------- forward ---------------------------------

def bottleneck_forward(x, blk):
    stride = blk["stride"]
    out = conv_bn_matmul(x, blk["conv1"], stride=1, padding=0, relu=True)
    if blk["conv2"]["kind"] == "direct3x3":
        out = conv_bn_direct3x3(out, blk["conv2"], relu=True)
    else:
        out = conv_bn_matmul(out, blk["conv2"], stride=stride, padding=1,
                             relu=True)
    if "dconv" in blk:
        identity = conv_bn_matmul(x, blk["dconv"], stride=stride, padding=0,
                                  relu=False)
    else:
        identity = x
    Nb, Ho, Wo, _ = out.shape
    res = identity.reshape(Nb * Ho * Wo, identity.shape[-1])
    # relu(bn3(conv3(out)) + identity) with the residual add fused into the
    # matmul epilogue (no separate add_relu pass over HBM).
    return conv_bn_matmul(out, blk["conv3"], stride=1, padding=0, relu=True,
                          residual=res)


def resnet_hash_forward(x_nchw, prepped):
    # NCHW (PyTorch) -> NHWC for kernel compute
    x = jnp.transpose(x_nchw, (0, 2, 3, 1)).astype(jnp.float32)
    x = conv_bn_matmul(x, prepped["stem"], stride=2, padding=3, relu=True)
    x = maxpool2d_3x3_s2_p1(x)
    for blocks in prepped["layers"]:
        for blk in blocks:
            x = bottleneck_forward(x, blk)
    N, H, W, C = x.shape
    feat = global_avgpool(x.reshape(N, H * W, C))   # (N, 2048) == x.view(N,-1)
    y = matmul_bias(feat, prepped["hash"], relu=False, residual=None,
                    out_dtype=jnp.float32)
    return y                                         # (N, hash_bit)


# ----------------------------------- main ------------------------------------

if __name__ == "__main__":
    key = jax.random.PRNGKey(0)
    k_param, k_input = jax.random.split(key)
    hash_bit = 32
    params = init_resnet50(k_param, hash_bit)
    prepped = prepare_params(params)

    # small NCHW input (ResNet50 conv1 requires 3 input channels)
    x = jax.random.normal(k_input, (2, 3, 32, 32), jnp.float32)

    y = resnet_hash_forward(x, prepped)
    y = jax.block_until_ready(y)
    assert y.shape == (2, hash_bit) and y.dtype == jnp.float32
    print("KERNEL_OK")
</pallas_src>

<mosaic_0001>
module attributes {stable_mosaic.version = 11 : i64} {
  func.func @_matmul_bias_kernel(%arg0: i32, %arg1: i32, %arg2: i32, %arg3: memref<256x147xbf16, #tpu.memory_space<vmem>>, %arg4: memref<147x64xbf16, #tpu.memory_space<vmem>>, %arg5: memref<1x64xf32, #tpu.memory_space<vmem>>, %arg6: memref<256x64xbf16, #tpu.memory_space<vmem>>, %arg7: memref<256x64xf32, #tpu.memory_space<vmem>>) attributes {dimension_semantics = [#tpu.dimension_semantics<parallel>, #tpu.dimension_semantics<parallel>, #tpu.dimension_semantics<arbitrary>], iteration_bounds = array<i64: 2, 1, 1>, scalar_prefetch = 0 : i64, scratch_operands = 1 : i64, tpu.core_type = #tpu.core_type<tc>, window_params = [{transform_indices = @transform_0, window_bounds = array<i64: 256, 147>}, {transform_indices = @transform_1, window_bounds = array<i64: 147, 64>}, {transform_indices = @transform_2, window_bounds = array<i64: 1, 64>}, {transform_indices = @transform_3, window_bounds = array<i64: 256, 64>}]} {
    %c0 = arith.constant 0 : index
    %c0_0 = arith.constant 0 : index
    %0 = vector.load %arg3[%c0, %c0_0] : memref<256x147xbf16, #tpu.memory_space<vmem>>, vector<256x147xbf16>
    %c0_1 = arith.constant 0 : index
    %c0_2 = arith.constant 0 : index
    %1 = vector.load %arg4[%c0_1, %c0_2] : memref<147x64xbf16, #tpu.memory_space<vmem>>, vector<147x64xbf16>
    %cst = arith.constant dense<0.000000e+00> : vector<256x64xf32>
    %2 = tpu.matmul %0, %1, %cst {dimension_numbers = #tpu.dot_dimension_numbers<[1], [0], [0], [1], [0, 0, 1, 1], [], []>} : vector<256x147xbf16>, vector<147x64xbf16>, vector<256x64xf32> -> vector<256x64xf32>
    %c0_i32 = arith.constant 0 : i32
    %3 = arith.cmpi eq, %arg2, %c0_i32 : i32
    %4 = arith.extui %3 : i1 to i32
    %c0_i32_3 = arith.constant 0 : i32
    %5 = arith.cmpi ne, %4, %c0_i32_3 : i32
    scf.if %5 {
      %c0_8 = arith.constant 0 : index
      %c0_9 = arith.constant 0 : index
      %12 = vector.load %arg7[%c0_8, %c0_9] : memref<256x64xf32, #tpu.memory_space<vmem>>, vector<256x64xf32>
      tpu.vector_store %arg7[%c0_8, %c0_9], %2 {strides = array<i32>} : memref<256x64xf32, #tpu.memory_space<vmem>>, vector<256x64xf32>,
    } else {
    }
    %c0_i32_4 = arith.constant 0 : i32
    %6 = arith.cmpi sgt, %arg2, %c0_i32_4 : i32
    %7 = arith.extui %6 : i1 to i32
    %c0_i32_5 = arith.constant 0 : i32
    %8 = arith.cmpi ne, %7, %c0_i32_5 : i32
    scf.if %8 {
      %c0_8 = arith.constant 0 : index
      %c0_9 = arith.constant 0 : index
      %12 = vector.load %arg7[%c0_8, %c0_9] : memref<256x64xf32, #tpu.memory_space<vmem>>, vector<256x64xf32>
      %13 = arith.addf %12, %2 : vector<256x64xf32>
      %c0_10 = arith.constant 0 : index
      %c0_11 = arith.constant 0 : index
      %14 = vector.load %arg7[%c0_10, %c0_11] : memref<256x64xf32, #tpu.memory_space<vmem>>, vector<256x64xf32>
      tpu.vector_store %arg7[%c0_10, %c0_11], %13 {strides = array<i32>} : memref<256x64xf32, #tpu.memory_space<vmem>>, vector<256x64xf32>,
    } else {
    }
    %c0_i32_6 = arith.constant 0 : i32
    %9 = arith.cmpi eq, %arg2, %c0_i32_6 : i32
    %10 = arith.extui %9 : i1 to i32
    %c0_i32_7 = arith.constant 0 : i32
    %11 = arith.cmpi ne, %10, %c0_i32_7 : i32
    scf.if %11 {
      %c0_8 = arith.constant 0 : index
      %c0_9 = arith.constant 0 : index
      %12 = vector.load %arg7[%c0_8, %c0_9] : memref<256x64xf32, #tpu.memory_space<vmem>>, vector<256x64xf32>
      %c0_10 = arith.constant 0 : index
      %c0_11 = arith.constant 0 : index
      %13 = vector.load %arg5[%c0_10, %c0_11] : memref<1x64xf32, #tpu.memory_space<vmem>>, vector<1x64xf32>
      %14 = vector.broadcast %13 : vector<1x64xf32> to vector<256x64xf32>
      %15 = arith.addf %12, %14 : vector<256x64xf32>
      %cst_12 = arith.constant 0.000000e+00 : f32
      %16 = vector.broadcast %cst_12 : f32 to vector<256x64xf32>
      %17 = arith.maximumf %15, %16 : vector<256x64xf32>
      %18 = arith.truncf %17 : vector<256x64xf32> to vector<256x64xbf16>
      %c0_13 = arith.constant 0 : index
      %c0_14 = arith.constant 0 : index
      %19 = vector.load %arg6[%c0_13, %c0_14] : memref<256x64xbf16, #tpu.memory_space<vmem>>, vector<256x64xbf16>
      tpu.vector_store %arg6[%c0_13, %c0_14], %18 {strides = array<i32>} : memref<256x64xbf16, #tpu.memory_space<vmem>>, vector<256x64xbf16>,
    } else {
    }
    return
  }
  func.func @transform_0(%arg0: i32, %arg1: i32, %arg2: i32) -> (i32, i32) {
    %c0_i32 = arith.constant 0 : i32
    return %arg0, %arg2 : i32, i32
  }
  func.func @transform_1(%arg0: i32, %arg1: i32, %arg2: i32) -> (i32, i32) {
    %c0_i32 = arith.constant 0 : i32
    return %arg2, %arg1 : i32, i32
  }
  func.func @transform_2(%arg0: i32, %arg1: i32, %arg2: i32) -> (i32, i32) {
    %c0_i32 = arith.constant 0 : i32
    %c0_i32_0 = arith.constant 0 : i32
    return %c0_i32, %arg1 : i32, i32
  }
  func.func @transform_3(%arg0: i32, %arg1: i32, %arg2: i32) -> (i32, i32) {
    %c0_i32 = arith.constant 0 : i32
    return %arg0, %arg1 : i32, i32
  }
}

</mosaic_0001>

<bundles_post_ra>
// kernel: tpu_custom_call.1
= control target key start
LH: loop header
LB: loop body
LE: loop exit
PB: predicated region body
PF: predicated region fallthrough
CT: control target
= control target key end

     0   :  { %s1544_s12 = smov 0   ;;  %s1546_s13 = smov 0   ;;  %s1796_s0 = inlined_call_operand.vmem [shape: bf16[512,147], index: 0, kind: input, shape index: {}]   ;;  %s1797_s1 = inlined_call_operand.vmem [shape: bf16[147,64], index: 1, kind: input, shape index: {}]   ;;  %s1798_s2 = inlined_call_operand.vmem [shape: f32[1,64], index: 2, kind: input, shape index: {}]   ;;  %s1799_s3 = inlined_call_operand.vmem [shape: bf16[512,64], index: 3, kind: output, shape index: {}]  }
   0x1   :  { %s1548_s14 = smov 0  }
   0x2 LB: > { %s32_s15 = sadd.s32 1, %s1516_s13  ;;  %p1262_p0 = scmp.ge.s32.totalorder %s1520_s14, 1  ;;  %s1520_s14 = sphi %s1548_s14, %s13_s14   ;;  %s1516_s13 = sphi %s1546_s13, %s1801_s13   ;;  %s1512_s12 = sphi %s1544_s12, %s1800_s12  }
   0x3   : > { %p34_p1 = scmp.ge.s32.totalorder %s32_s15, 2  ;;  %p191_p2 = scmp.lt.s32.totalorder %s1520_s14, 3 }
   0x5   : > { %s1803_s15 = smov (%p34_p1, %s32_s15), 0  ;;  %p192_p3 = pnand %p1262_p0, %p191_p2 }
   0x6   : > { %v1440_v0 = vld [vmem:[%s1797_s1] sm:$0xff] (!%p192_p3)   ;;  %v1522_v1 = vmov (!%p192_p3), 0   ;;  %v1441_v2 = vld [vmem:[%s1797_s1 + $0x8] sm:$0xff] (!%p192_p3)   ;;  %v1442_v3 = vld [vmem:[%s1797_s1 + $0x10] sm:$0xff] (!%p192_p3)   ;;  %s1263_s22 = sshll.u32 (!%p192_p3), %s1512_s12, 5  ;;  %vm520_vm0 = vcmask (!%p192_p3), 154624  }
   0x7   : > { %195 = sbr.rel (%p192_p3) target bundleno = 335 (0x14f), region = 32  ;;  %576 = vmatprep.subr.bf16.mxu0 (!%p192_p3), %v1522_v1  ;;  %1394 = vmatprep.subr.bf16.mxu1 (!%p192_p3), %v1522_v1  ;;  %p236_p4 = scmp.lt.s32.totalorder (!%p192_p3), %s1263_s22, 63  ;;  %v1443_v4 = vld [vmem:[%s1797_s1 + $0x18] sm:$0xff] (!%p192_p3)   ;;  %v1444_v5 = vld [vmem:[%s1797_s1 + $0x20] sm:$0xff] (!%p192_p3)   ;;  %v1445_v8 = vld [vmem:[%s1797_s1 + $0x28] sm:$0xff] (!%p192_p3)   ;;  %vm569_vm1 = vcmask (!%p192_p3), 1040384  }
   0x8   : > { %577 = vmatpush1.bf16.msra.mxu0 (!%p192_p3), %v1440_v0  ;;  %1404 = vmatpush1.bf16.msra.mxu1 (!%p192_p3), %v1440_v0  ;;  %v1446_v9 = vld [vmem:[%s1797_s1 + $0x30] sm:$0xff] (!%p192_p3)   ;;  %v1447_v10 = vld [vmem:[%s1797_s1 + $0x38] sm:$0xff] (!%p192_p3)   ;;  %vm570_vm2 = vcmask (!%p192_p3), 1041408   ;;  %v1523_v11 = vmov (!%p192_p3), 65535   ;;  %v1448_v13 = vld [vmem:[%s1797_s1 + $0x40] sm:$0xff] (!%p192_p3)   ;;  %vm741_vm3 = vcmask (!%p192_p3), 523264  }
   0x9   : > { %578 = vmatprep.subr.bf16.mxu0 (!%p192_p3), %v1522_v1  ;;  %1395 = vmatprep.subr.bf16.mxu1 (!%p192_p3), %v1522_v1  ;;  %v571_v12 = vsel (!%p192_p3), %vm569_vm1, 4294967295, %v1523_v11  ;;  %v1449_v14 = vld [vmem:[%s1797_s1 + $0x48] ss:$0 sps:$4 sm:$0x33] (!%p192_p3)   ;;  %v1655_v55 = vld [vmem:[%s1798_s2] ss:$0 sm:$0xff] (!%p192_p3) }
   0xa   : > { %v572_v15 = vsel (!%p192_p3), %vm570_vm2, %v571_v12, 0  ;;  %vm1109_vm4 = vcmask (!%p192_p3), 519168  }
   0xb   : > { %v574_v16 = vand.u32 (!%p192_p3), %v1449_v14, %v572_v15 }
   0xc   : > { %579 = vmatpush1.bf16.msra.mxu0 (!%p192_p3), %v1441_v2  ;;  %1405 = vmatpush1.bf16.msra.mxu1 (!%p192_p3), %v1441_v2 }
   0xd   : > { %580 = vmatprep.subr.bf16.mxu0 (!%p192_p3), %v1522_v1  ;;  %1396 = vmatprep.subr.bf16.mxu1 (!%p192_p3), %v1522_v1 }
   0xe   : > { %s1805_s22 = smov (!%p236_p4, %s1263_s22), 63 }
   0xf   : > { %s1361_s25 = sshll.u32 %s1805_s22, 3  ;;  %s1267_s19 = sshll.u32 %s1805_s22, 2 }
  0x10   : > { %581 = vmatpush1.bf16.msra.mxu0 %v1442_v3  ;;  %1406 = vmatpush1.bf16.msra.mxu1 %v1442_v3  ;;  %s1580_s28 = scalar_lea.vmem %s1796_s0, %s1361_s25  ;;  %s1669_s22 = scalar_lea.vmem %s1799_s3, %s1267_s19 }
  0x11   : > { %582 = vmatprep.subr.bf16.mxu0 %v1522_v1  ;;  %1397 = vmatprep.subr.bf16.mxu1 %v1522_v1  ;;  %v1452_v6 = vld [vmem:[%s1580_s28 + $0x4] ss:$8 sps:$4 sm:$0xff]   ;;  %v1450_v17 = vld [vmem:[%s1580_s28] ss:$8 sps:$4 sm:$0xff]   ;;  %v1456_v19 = vld [vmem:[%s1580_s28 + $0x14] ss:$8 sps:$4 sm:$0xff]  }
  0x12   : > { %v1455_v7 = vld [vmem:[%s1580_s28 + $0x84] ss:$8 sps:$4 sm:$0xff]   ;;  %1310 = vmatprep.mubr.msk.bf16.mxu0 %vm520_vm0, %v1452_v6  ;;  %v1453_v18 = vld [vmem:[%s1580_s28 + $0x80] ss:$8 sps:$4 sm:$0xff]   ;;  %v1458_v20 = vld [vmem:[%s1580_s28 + $0x94] ss:$8 sps:$4 sm:$0xff]  }
  0x13   : > { %1318 = vmatprep.mubr.msk.bf16.mxu1 %vm520_vm0, %v1455_v7  ;;  %v1460_v21 = vld [vmem:[%s1580_s28 + $0x10] ss:$8 sps:$4 sm:$0xff]   ;;  %v1462_v23 = vld [vmem:[%s1580_s28 + $0x24] ss:$8 sps:$4 sm:$0xff]   ;;  %v1466_v25 = vld [vmem:[%s1580_s28 + $0x20] ss:$8 sps:$4 sm:$0xff]  }
  0x14   : > { %583 = vmatpush1.bf16.msra.mxu0 %v1443_v4  ;;  %1407 = vmatpush1.bf16.msra.mxu1 %v1443_v4  ;;  %v1461_v22 = vld [vmem:[%s1580_s28 + $0x90] ss:$8 sps:$4 sm:$0xff]   ;;  %v1464_v24 = vld [vmem:[%s1580_s28 + $0xa4] ss:$8 sps:$4 sm:$0xff]   ;;  %v1467_v26 = vld [vmem:[%s1580_s28 + $0xa0] ss:$8 sps:$4 sm:$0xff]  }
  0x15   : > { %584 = vmatprep.subr.bf16.mxu0 %v1522_v1  ;;  %1398 = vmatprep.subr.bf16.mxu1 %v1522_v1  ;;  %v1468_v27 = vld [vmem:[%s1580_s28 + $0x34] ss:$8 sps:$4 sm:$0xff]   ;;  %v1472_v29 = vld [vmem:[%s1580_s28 + $0x30] ss:$8 sps:$4 sm:$0xff]   ;;  %v1474_v31 = vld [vmem:[%s1580_s28 + $0x44] ss:$8 sps:$4 sm:$0xff]  }
  0x16   : > { %v1470_v28 = vld [vmem:[%s1580_s28 + $0xb4] ss:$8 sps:$4 sm:$0xff]   ;;  %v1473_v30 = vld [vmem:[%s1580_s28 + $0xb0] ss:$8 sps:$4 sm:$0xff]   ;;  %v1476_v32 = vld [vmem:[%s1580_s28 + $0xc4] ss:$8 sps:$4 sm:$0xff]  }
  0x17   : > { %v1478_v33 = vld [vmem:[%s1580_s28 + $0x40] ss:$8 sps:$4 sm:$0xff]   ;;  %v1480_v35 = vld [vmem:[%s1580_s28 + $0x54] ss:$8 sps:$4 sm:$0xff]   ;;  %v1484_v37 = vld [vmem:[%s1580_s28 + $0x50] ss:$8 sps:$4 sm:$0xff]  }
  0x18   : > { %585 = vmatpush1.bf16.msra.mxu0 %v1444_v5  ;;  %1408 = vmatpush1.bf16.msra.mxu1 %v1444_v5  ;;  %v1479_v34 = vld [vmem:[%s1580_s28 + $0xc0] ss:$8 sps:$4 sm:$0xff]   ;;  %v1482_v36 = vld [vmem:[%s1580_s28 + $0xd4] ss:$8 sps:$4 sm:$0xff]   ;;  %v1485_v38 = vld [vmem:[%s1580_s28 + $0xd0] ss:$8 sps:$4 sm:$0xff]  }
  0x19   : > { %586 = vmatprep.subr.bf16.mxu0 %v1522_v1  ;;  %1399 = vmatprep.subr.bf16.mxu1 %v1522_v1  ;;  %v1486_v39 = vld [vmem:[%s1580_s28 + $0x64] ss:$8 sps:$4 sm:$0xff]   ;;  %v1490_v41 = vld [vmem:[%s1580_s28 + $0x60] ss:$8 sps:$4 sm:$0xff]   ;;  %v1492_v43 = vld [vmem:[%s1580_s28 + $0x74] ss:$8 sps:$4 sm:$0xff]  }
  0x1a   : > { %v1488_v40 = vld [vmem:[%s1580_s28 + $0xe4] ss:$8 sps:$4 sm:$0xff]   ;;  %v1491_v42 = vld [vmem:[%s1580_s28 + $0xe0] ss:$8 sps:$4 sm:$0xff]   ;;  %v1494_v44 = vld [vmem:[%s1580_s28 + $0xf4] ss:$8 sps:$4 sm:$0xff]  }
  0x1b   : > { %v1496_v45 = vld [vmem:[%s1580_s28 + $0x70] ss:$8 sps:$4 sm:$0xff]  }
  0x1c   : > { %587 = vmatpush1.bf16.msra.mxu0 %v1445_v8  ;;  %1409 = vmatpush1.bf16.msra.mxu1 %v1445_v8  ;;  %v1497_v46 = vld [vmem:[%s1580_s28 + $0xf0] ss:$8 sps:$4 sm:$0xff]  }
  0x1d   : > { %588 = vmatprep.subr.bf16.mxu0 %v1522_v1  ;;  %1400 = vmatprep.subr.bf16.mxu1 %v1522_v1 }
  0x20   : > { %589 = vmatpush1.bf16.msra.mxu0 %v1446_v9  ;;  %1410 = vmatpush1.bf16.msra.mxu1 %v1446_v9 }
  0x21   : > { %590 = vmatprep.subr.bf16.mxu0 %v1522_v1  ;;  %1401 = vmatprep.subr.bf16.mxu1 %v1522_v1 }
  0x24   : > { %591 = vmatpush1.bf16.msra.mxu0 %v1447_v10  ;;  %1411 = vmatpush1.bf16.msra.mxu1 %v1447_v10 }
  0x25   : > { %592 = vmatprep.subr.bf16.mxu0 %v1522_v1  ;;  %1402 = vmatprep.subr.bf16.mxu1 %v1522_v1 }
  0x28   : > { %593 = vmatpush1.bf16.msra.mxu0 %v1448_v13  ;;  %1412 = vmatpush1.bf16.msra.mxu1 %v1448_v13 }
  0x29   : > { %594 = vmatprep.subr.bf16.mxu0 %v1522_v1  ;;  %1403 = vmatprep.subr.bf16.mxu1 %v1522_v1 }
  0x2c   : > { %595 = vmatpush1.bf16.msra.mxu0 %v574_v16  ;;  %1413 = vmatpush1.bf16.msra.mxu1 %v574_v16 }
  0x2f   : > { %609 = vmatmul.mubr.bf16.vlgmr.msra.gmra.mrb[0].mxu0 %v1450_v17  ;;  %673 = vmatmul.mubr.bf16.vlgmr.msra.gmra.mrb[0].mxu1 %v1453_v18 }
  0x30   : > { %1311 = vmatprep.mubr.msk.bf16.mxu0 %vm520_vm0, %v1456_v19  ;;  %1319 = vmatprep.mubr.msk.bf16.mxu1 %vm520_vm0, %v1458_v20 }
  0x37   : > { %617 = vmatmul.mubr.bf16.gmra.mrb[4].mxu0 %v1460_v21  ;;  %681 = vmatmul.mubr.bf16.gmra.mrb[4].mxu1 %v1461_v22 }
  0x38   : > { %1312 = vmatprep.mubr.msk.bf16.mxu0 %vm520_vm0, %v1462_v23  ;;  %1320 = vmatprep.mubr.msk.bf16.mxu1 %vm520_vm0, %v1464_v24 }
  0x3f   : > { %625 = vmatmul.mubr.bf16.gmra.mrb[8].mxu0 %v1466_v25  ;;  %689 = vmatmul.mubr.bf16.gmra.mrb[8].mxu1 %v1467_v26 }
  0x40   : > { %1313 = vmatprep.mubr.msk.bf16.mxu0 %vm520_vm0, %v1468_v27  ;;  %1321 = vmatprep.mubr.msk.bf16.mxu1 %vm520_vm0, %v1470_v28 }
  0x47   : > { %633 = vmatmul.mubr.bf16.gmra.mrb[12].mxu0 %v1472_v29  ;;  %697 = vmatmul.mubr.bf16.gmra.mrb[12].mxu1 %v1473_v30 }
  0x48   : > { %1314 = vmatprep.mubr.msk.bf16.mxu0 %vm520_vm0, %v1474_v31  ;;  %1322 = vmatprep.mubr.msk.bf16.mxu1 %vm520_vm0, %v1476_v32 }
  0x4f   : > { %641 = vmatmul.mubr.bf16.gmra.mrb[16].mxu0 %v1478_v33  ;;  %705 = vmatmul.mubr.bf16.gmra.mrb[16].mxu1 %v1479_v34 }
  0x50   : > { %1315 = vmatprep.mubr.msk.bf16.mxu0 %vm520_vm0, %v1480_v35  ;;  %1323 = vmatprep.mubr.msk.bf16.mxu1 %vm520_vm0, %v1482_v36 }
  0x57   : > { %649 = vmatmul.mubr.bf16.gmra.mrb[20].mxu0 %v1484_v37  ;;  %713 = vmatmul.mubr.bf16.gmra.mrb[20].mxu1 %v1485_v38 }
  0x58   : > { %1316 = vmatprep.mubr.msk.bf16.mxu0 %vm520_vm0, %v1486_v39  ;;  %1324 = vmatprep.mubr.msk.bf16.mxu1 %vm520_vm0, %v1488_v40 }
  0x5f   : > { %657 = vmatmul.mubr.bf16.gmra.mrb[24].mxu0 %v1490_v41  ;;  %721 = vmatmul.mubr.bf16.gmra.mrb[24].mxu1 %v1491_v42 }
  0x60   : > { %1317 = vmatprep.mubr.msk.bf16.mxu0 %vm520_vm0, %v1492_v43  ;;  %1325 = vmatprep.mubr.msk.bf16.mxu1 %vm520_vm0, %v1494_v44 }
  0x67   : > { %665 = vmatmul.mubr.bf16.gmra.mrb[28].mxu0 %v1496_v45  ;;  %729 = vmatmul.mubr.bf16.gmra.mrb[28].mxu1 %v1497_v46 }
 0x102   : > { %v610_v47 = vpop.f32.mrb[0].mxu0  ;;  %v674_v48 = vpop.f32.mrb[0].mxu1 }
 0x103   : > { %742 = vst.msk [vmem:[#allocation2] sm:$0xff] %vm741_vm3, %v610_v47  ;;  %758 = vst.msk [vmem:[#allocation2 + $0x80] sm:$0xff] %vm741_vm3, %v674_v48  ;;  %v612_v49 = vpop.f32.mrb[1].mxu0  ;;  %v676_v50 = vpop.f32.mrb[1].mxu1 }
 0x104   : > { %v613_v51 = vpop.f32.mrb[2].mxu0  ;;  %v677_v52 = vpop.f32.mrb[2].mxu1 }
 0x105   : > { %743 = vst.msk [vmem:[#allocation2 + $0x8] sm:$0xff] %vm741_vm3, %v613_v51  ;;  %759 = vst.msk [vmem:[#allocation2 + $0x88] sm:$0xff] %vm741_vm3, %v677_v52  ;;  %v615_v53 = vpop.f32.mrb[3].mxu0  ;;  %v679_v54 = vpop.f32.mrb[3].mxu1 }
 0x10a   : > { %v878_v56 = vld [vmem:[#allocation2] sm:$0xff]  ;;  %v618_v58 = vpop.f32.mrb[4].mxu0  ;;  %v682_v59 = vpop.f32.mrb[4].mxu1 }
 0x10b   : > { %v894_v57 = vld [vmem:[#allocation2 + $0x80] sm:$0xff]  ;;  %v917_v60 = vadd.f32 %v1655_v55, %v878_v56  ;;  %744 = vst.msk [vmem:[#allocation2 + $0x10] sm:$0xff] %vm741_vm3, %v618_v58  ;;  %760 = vst.msk [vmem:[#allocation2 + $0x90] sm:$0xff] %vm741_vm3, %v682_v59  ;;  %v620_v62 = vpop.f32.mrb[5].mxu0  ;;  %v684_v63 = vpop.f32.mrb[5].mxu1 }
 0x10c   : > { %v933_v61 = vadd.f32 %v1655_v55, %v894_v57  ;;  %v879_v0 = vld [vmem:[#allocation2 + $0x8] sm:$0xff]  ;;  %v621_v2 = vpop.f32.mrb[6].mxu0  ;;  %v685_v3 = vpop.f32.mrb[6].mxu1 }
 0x10d   : > { %v895_v1 = vld [vmem:[#allocation2 + $0x88] sm:$0xff]  ;;  %v949_v4 = vmax.f32 %v917_v60, 0.0  ;;  %v918_v6 = vadd.f32 %v1655_v55, %v879_v0  ;;  %745 = vst.msk [vmem:[#allocation2 + $0x18] sm:$0xff] %vm741_vm3, %v621_v2  ;;  %761 = vst.msk [vmem:[#allocation2 + $0x98] sm:$0xff] %vm741_vm3, %v685_v3  ;;  %v623_v8 = vpop.f32.mrb[7].mxu0  ;;  %v687_v9 = vpop.f32.mrb[7].mxu1 }
 0x10e   : > { %v965_v5 = vmax.f32 %v933_v61, 0.0  ;;  %v934_v7 = vadd.f32 %v1655_v55, %v895_v1 }
 0x10f   : > { %v1362_v10 = vpack.c.bf16 %v949_v4, %v949_v4  ;;  %v950_v12 = vmax.f32 %v918_v6, 0.0 }
 0x110   : > { %v1378_v11 = vpack.c.bf16 %v965_v5, %v965_v5  ;;  %v966_v13 = vmax.f32 %v934_v7, 0.0 }
 0x111   : > { %1110 = vst.msk [vmem:[%s1669_s22] sm:$0xf] %vm1109_vm4, %v1362_v10  ;;  %v1363_v14 = vpack.c.bf16 %v950_v12, %v950_v12 }
 0x112   : > { %1126 = vst.msk [vmem:[%s1669_s22 + $0x40] sm:$0xf] %vm1109_vm4, %v1378_v11  ;;  %v1379_v15 = vpack.c.bf16 %v966_v13, %v966_v13  ;;  %v880_v16 = vld [vmem:[#allocation2 + $0x10] sm:$0xff]  ;;  %v626_v18 = vpop.f32.mrb[8].mxu0  ;;  %v690_v19 = vpop.f32.mrb[8].mxu1 }
 0x113   : > { %v896_v17 = vld [vmem:[#allocation2 + $0x90] sm:$0xff]  ;;  %1111 = vst.msk [vmem:[%s1669_s22 + $0x4] sm:$0xf] %vm1109_vm4, %v1363_v14  ;;  %v919_v20 = vadd.f32 %v1655_v55, %v880_v16  ;;  %v628_v22 = vpop.f32.mrb[9].mxu0  ;;  %v692_v23 = vpop.f32.mrb[9].mxu1 }
 0x114   : > { %1127 = vst.msk [vmem:[%s1669_s22 + $0x44] sm:$0xf] %vm1109_vm4, %v1379_v15  ;;  %v935_v21 = vadd.f32 %v1655_v55, %v896_v17  ;;  %v881_v24 = vld [vmem:[#allocation2 + $0x18] sm:$0xff]  ;;  %v629_v26 = vpop.f32.mrb[10].mxu0  ;;  %v693_v27 = vpop.f32.mrb[10].mxu1 }
 0x115   : > { %746 = vst.msk [vmem:[#allocation2 + $0x20] sm:$0xff] %vm741_vm3, %v626_v18  ;;  %762 = vst.msk [vmem:[#allocation2 + $0xa0] sm:$0xff] %vm741_vm3, %v690_v19  ;;  %v897_v25 = vld [vmem:[#allocation2 + $0x98] sm:$0xff]  ;;  %v951_v28 = vmax.f32 %v919_v20, 0.0  ;;  %v920_v30 = vadd.f32 %v1655_v55, %v881_v24  ;;  %v631_v32 = vpop.f32.mrb[11].mxu0  ;;  %v695_v33 = vpop.f32.mrb[11].mxu1 }
 0x116   : > { %v967_v29 = vmax.f32 %v935_v21, 0.0  ;;  %v936_v31 = vadd.f32 %v1655_v55, %v897_v25  ;;  %747 = vst.msk [vmem:[#allocation2 + $0x28] sm:$0xff] %vm741_vm3, %v629_v26  ;;  %763 = vst.msk [vmem:[#allocation2 + $0xa8] sm:$0xff] %vm741_vm3, %v693_v27 }
 0x117   : > { %v1364_v34 = vpack.c.bf16 %v951_v28, %v951_v28  ;;  %v952_v36 = vmax.f32 %v920_v30, 0.0 }
 0x118   : > { %v1380_v35 = vpack.c.bf16 %v967_v29, %v967_v29  ;;  %v968_v37 = vmax.f32 %v936_v31, 0.0 }
 0x119   : > { %1112 = vst.msk [vmem:[%s1669_s22 + $0x8] sm:$0xf] %vm1109_vm4, %v1364_v34  ;;  %v1365_v38 = vpack.c.bf16 %v952_v36, %v952_v36 }
 0x11a   : > { %1128 = vst.msk [vmem:[%s1669_s22 + $0x48] sm:$0xf] %vm1109_vm4, %v1380_v35  ;;  %v1381_v39 = vpack.c.bf16 %v968_v37, %v968_v37  ;;  %v634_v42 = vpop.f32.mrb[12].mxu0  ;;  %v698_v43 = vpop.f32.mrb[12].mxu1 }
 0x11b   : > { %1113 = vst.msk [vmem:[%s1669_s22 + $0xc] sm:$0xf] %vm1109_vm4, %v1365_v38  ;;  %v636_v46 = vpop.f32.mrb[13].mxu0  ;;  %v700_v47 = vpop.f32.mrb[13].mxu1 }
 0x11c   : > { %v882_v40 = vld [vmem:[#allocation2 + $0x20] sm:$0xff]  ;;  %1129 = vst.msk [vmem:[%s1669_s22 + $0x4c] sm:$0xf] %vm1109_vm4, %v1381_v39  ;;  %v637_v50 = vpop.f32.mrb[14].mxu0  ;;  %v701_v51 = vpop.f32.mrb[14].mxu1 }
 0x11d   : > { %v898_v41 = vld [vmem:[#allocation2 + $0xa0] sm:$0xff]  ;;  %v921_v44 = vadd.f32 %v1655_v55, %v882_v40  ;;  %748 = vst.msk [vmem:[#allocation2 + $0x30] sm:$0xff] %vm741_vm3, %v634_v42  ;;  %764 = vst.msk [vmem:[#allocation2 + $0xb0] sm:$0xff] %vm741_vm3, %v698_v43  ;;  %v883_v48 = vld [vmem:[#allocation2 + $0x28] sm:$0xff]  ;;  %v639_v57 = vpop.f32.mrb[15].mxu0  ;;  %v703_v58 = vpop.f32.mrb[15].mxu1 }
 0x11e   : > { %v937_v45 = vadd.f32 %v1655_v55, %v898_v41  ;;  %v899_v49 = vld [vmem:[#allocation2 + $0xa8] sm:$0xff]  ;;  %v922_v54 = vadd.f32 %v1655_v55, %v883_v48  ;;  %749 = vst.msk [vmem:[#allocation2 + $0x38] sm:$0xff] %vm741_vm3, %v637_v50  ;;  %765 = vst.msk [vmem:[#allocation2 + $0xb8] sm:$0xff] %vm741_vm3, %v701_v51 }
 0x11f   : > { %v953_v52 = vmax.f32 %v921_v44, 0.0  ;;  %v938_v56 = vadd.f32 %v1655_v55, %v899_v49 }
 0x120   : > { %v969_v53 = vmax.f32 %v937_v45, 0.0  ;;  %v954_v61 = vmax.f32 %v922_v54, 0.0 }
 0x121   : > { %v1366_v59 = vpack.c.bf16 %v953_v52, %v953_v52  ;;  %v970_v62 = vmax.f32 %v938_v56, 0.0 }
 0x122   : > { %v1382_v60 = vpack.c.bf16 %v969_v53, %v969_v53  ;;  %v1367_v63 = vpack.c.bf16 %v954_v61, %v954_v61  ;;  %v642_v3 = vpop.f32.mrb[16].mxu0  ;;  %v706_v4 = vpop.f32.mrb[16].mxu1 }
 0x123   : > { %1114 = vst.msk [vmem:[%s1669_s22 + $0x10] sm:$0xf] %vm1109_vm4, %v1366_v59  ;;  %v1383_v0 = vpack.c.bf16 %v970_v62, %v970_v62  ;;  %v644_v7 = vpop.f32.mrb[17].mxu0  ;;  %v708_v8 = vpop.f32.mrb[17].mxu1 }
 0x124   : > { %1130 = vst.msk [vmem:[%s1669_s22 + $0x50] sm:$0xf] %vm1109_vm4, %v1382_v60  ;;  %v884_v1 = vld [vmem:[#allocation2 + $0x30] sm:$0xff]  ;;  %1115 = vst.msk [vmem:[%s1669_s22 + $0x14] sm:$0xf] %vm1109_vm4, %v1367_v63  ;;  %v645_v11 = vpop.f32.mrb[18].mxu0 }
 0x125   : > { %v900_v2 = vld [vmem:[#allocation2 + $0xb0] sm:$0xff]  ;;  %1131 = vst.msk [vmem:[%s1669_s22 + $0x54] sm:$0xf] %vm1109_vm4, %v1383_v0  ;;  %v923_v5 = vadd.f32 %v1655_v55, %v884_v1  ;;  %v885_v9 = vld [vmem:[#allocation2 + $0x38] sm:$0xff]  ;;  %v709_v12 = vpop.f32.mrb[18].mxu1  ;;  %v647_v17 = vpop.f32.mrb[19].mxu0 }
 0x126   : > { %v939_v6 = vadd.f32 %v1655_v55, %v900_v2  ;;  %750 = vst.msk [vmem:[#allocation2 + $0x40] sm:$0xff] %vm741_vm3, %v642_v3  ;;  %766 = vst.msk [vmem:[#allocation2 + $0xc0] sm:$0xff] %vm741_vm3, %v706_v4  ;;  %v901_v10 = vld [vmem:[#allocation2 + $0xb8] sm:$0xff]  ;;  %v924_v15 = vadd.f32 %v1655_v55, %v885_v9  ;;  %v711_v18 = vpop.f32.mrb[19].mxu1 }
 0x127   : > { %v955_v13 = vmax.f32 %v923_v5, 0.0  ;;  %v940_v16 = vadd.f32 %v1655_v55, %v901_v10  ;;  %751 = vst.msk [vmem:[#allocation2 + $0x48] sm:$0xff] %vm741_vm3, %v645_v11  ;;  %767 = vst.msk [vmem:[#allocation2 + $0xc8] sm:$0xff] %vm741_vm3, %v709_v12 }
 0x128   : > { %v971_v14 = vmax.f32 %v939_v6, 0.0  ;;  %v956_v21 = vmax.f32 %v924_v15, 0.0 }
 0x129   : > { %v1368_v19 = vpack.c.bf16 %v955_v13, %v955_v13  ;;  %v972_v22 = vmax.f32 %v940_v16, 0.0 }
 0x12a   : > { %v1384_v20 = vpack.c.bf16 %v971_v14, %v971_v14  ;;  %v1369_v23 = vpack.c.bf16 %v956_v21, %v956_v21  ;;  %v650_v27 = vpop.f32.mrb[20].mxu0  ;;  %v714_v28 = vpop.f32.mrb[20].mxu1 }
 0x12b   : > { %1116 = vst.msk [vmem:[%s1669_s22 + $0x18] sm:$0xf] %vm1109_vm4, %v1368_v19  ;;  %v1385_v24 = vpack.c.bf16 %v972_v22, %v972_v22  ;;  %v652_v31 = vpop.f32.mrb[21].mxu0  ;;  %v716_v32 = vpop.f32.mrb[21].mxu1 }
 0x12c   : > { %1132 = vst.msk [vmem:[%s1669_s22 + $0x58] sm:$0xf] %vm1109_vm4, %v1384_v20  ;;  %1117 = vst.msk [vmem:[%s1669_s22 + $0x1c] sm:$0xf] %vm1109_vm4, %v1369_v23  ;;  %v653_v35 = vpop.f32.mrb[22].mxu0  ;;  %v717_v36 = vpop.f32.mrb[22].mxu1 }
 0x12d   : > { %v886_v25 = vld [vmem:[#allocation2 + $0x40] sm:$0xff]  ;;  %1133 = vst.msk [vmem:[%s1669_s22 + $0x5c] sm:$0xf] %vm1109_vm4, %v1385_v24  ;;  %v655_v41 = vpop.f32.mrb[23].mxu0  ;;  %v719_v42 = vpop.f32.mrb[23].mxu1 }
 0x12e   : > { %v902_v26 = vld [vmem:[#allocation2 + $0xc0] sm:$0xff]  ;;  %v925_v29 = vadd.f32 %v1655_v55, %v886_v25  ;;  %752 = vst.msk [vmem:[#allocation2 + $0x50] sm:$0xff] %vm741_vm3, %v650_v27  ;;  %768 = vst.msk [vmem:[#allocation2 + $0xd0] sm:$0xff] %vm741_vm3, %v714_v28  ;;  %v887_v33 = vld [vmem:[#allocation2 + $0x48] sm:$0xff] }
 0x12f   : > { %v941_v30 = vadd.f32 %v1655_v55, %v902_v26  ;;  %v903_v34 = vld [vmem:[#allocation2 + $0xc8] sm:$0xff]  ;;  %v926_v39 = vadd.f32 %v1655_v55, %v887_v33  ;;  %753 = vst.msk [vmem:[#allocation2 + $0x58] sm:$0xff] %vm741_vm3, %v653_v35  ;;  %769 = vst.msk [vmem:[#allocation2 + $0xd8] sm:$0xff] %vm741_vm3, %v717_v36 }
 0x130   : > { %v957_v37 = vmax.f32 %v925_v29, 0.0  ;;  %v942_v40 = vadd.f32 %v1655_v55, %v903_v34 }
 0x131   : > { %v973_v38 = vmax.f32 %v941_v30, 0.0  ;;  %v958_v45 = vmax.f32 %v926_v39, 0.0 }
 0x132   : > { %v1370_v43 = vpack.c.bf16 %v957_v37, %v957_v37  ;;  %v974_v46 = vmax.f32 %v942_v40, 0.0  ;;  %v658_v51 = vpop.f32.mrb[24].mxu0  ;;  %v722_v52 = vpop.f32.mrb[24].mxu1 }
 0x133   : > { %v1386_v44 = vpack.c.bf16 %v973_v38, %v973_v38  ;;  %v1371_v47 = vpack.c.bf16 %v958_v45, %v958_v45  ;;  %754 = vst.msk [vmem:[#allocation2 + $0x60] sm:$0xff] %vm741_vm3, %v658_v51  ;;  %770 = vst.msk [vmem:[#allocation2 + $0xe0] sm:$0xff] %vm741_vm3, %v722_v52  ;;  %v660_v56 = vpop.f32.mrb[25].mxu0  ;;  %v724_v57 = vpop.f32.mrb[25].mxu1 }
 0x134   : > { %1118 = vst.msk [vmem:[%s1669_s22 + $0x20] sm:$0xf] %vm1109_vm4, %v1370_v43  ;;  %v1387_v48 = vpack.c.bf16 %v974_v46, %v974_v46  ;;  %v661_v60 = vpop.f32.mrb[26].mxu0  ;;  %v725_v61 = vpop.f32.mrb[26].mxu1 }
 0x135   : > { %1134 = vst.msk [vmem:[%s1669_s22 + $0x60] sm:$0xf] %vm1109_vm4, %v1386_v44  ;;  %v888_v49 = vld [vmem:[#allocation2 + $0x50] sm:$0xff]  ;;  %1119 = vst.msk [vmem:[%s1669_s22 + $0x24] sm:$0xf] %vm1109_vm4, %v1371_v47  ;;  %v663_v2 = vpop.f32.mrb[27].mxu0 }
 0x136   : > { %v904_v50 = vld [vmem:[#allocation2 + $0xd0] sm:$0xff]  ;;  %1135 = vst.msk [vmem:[%s1669_s22 + $0x64] sm:$0xf] %vm1109_vm4, %v1387_v48  ;;  %v927_v53 = vadd.f32 %v1655_v55, %v888_v49  ;;  %v889_v58 = vld [vmem:[#allocation2 + $0x58] sm:$0xff]  ;;  %v727_v3 = vpop.f32.mrb[27].mxu1 }
 0x137   : > { %v943_v54 = vadd.f32 %v1655_v55, %v904_v50  ;;  %v905_v59 = vld [vmem:[#allocation2 + $0xd8] sm:$0xff]  ;;  %v928_v0 = vadd.f32 %v1655_v55, %v889_v58  ;;  %755 = vst.msk [vmem:[#allocation2 + $0x68] sm:$0xff] %vm741_vm3, %v661_v60  ;;  %771 = vst.msk [vmem:[#allocation2 + $0xe8] sm:$0xff] %vm741_vm3, %v725_v61 }
 0x138   : > { %v959_v62 = vmax.f32 %v927_v53, 0.0  ;;  %v944_v1 = vadd.f32 %v1655_v55, %v905_v59 }
 0x139   : > { %v975_v63 = vmax.f32 %v943_v54, 0.0  ;;  %v960_v6 = vmax.f32 %v928_v0, 0.0 }
 0x13a   : > { %v1372_v4 = vpack.c.bf16 %v959_v62, %v959_v62  ;;  %v976_v7 = vmax.f32 %v944_v1, 0.0  ;;  %v890_v10 = vld [vmem:[#allocation2 + $0x60] sm:$0xff]  ;;  %v666_v12 = vpop.f32.mrb[28].mxu0  ;;  %v730_v13 = vpop.f32.mrb[28].mxu1 }
 0x13b   : > { %v1388_v5 = vpack.c.bf16 %v975_v63, %v975_v63  ;;  %v1373_v8 = vpack.c.bf16 %v960_v6, %v960_v6  ;;  %v906_v11 = vld [vmem:[#allocation2 + $0xe0] sm:$0xff]  ;;  %v929_v14 = vadd.f32 %v1655_v55, %v890_v10  ;;  %756 = vst.msk [vmem:[#allocation2 + $0x70] sm:$0xff] %vm741_vm3, %v666_v12  ;;  %772 = vst.msk [vmem:[#allocation2 + $0xf0] sm:$0xff] %vm741_vm3, %v730_v13  ;;  %v668_v16 = vpop.f32.mrb[29].mxu0  ;;  %v732_v17 = vpop.f32.mrb[29].mxu1 }
 0x13c   : > { %1120 = vst.msk [vmem:[%s1669_s22 + $0x28] sm:$0xf] %vm1109_vm4, %v1372_v4  ;;  %v1389_v9 = vpack.c.bf16 %v976_v7, %v976_v7  ;;  %v945_v15 = vadd.f32 %v1655_v55, %v906_v11  ;;  %v669_v20 = vpop.f32.mrb[30].mxu0  ;;  %v733_v21 = vpop.f32.mrb[30].mxu1 }
 0x13d   : > { %1136 = vst.msk [vmem:[%s1669_s22 + $0x68] sm:$0xf] %vm1109_vm4, %v1388_v5  ;;  %1121 = vst.msk [vmem:[%s1669_s22 + $0x2c] sm:$0xf] %vm1109_vm4, %v1373_v8  ;;  %v961_v22 = vmax.f32 %v929_v14, 0.0  ;;  %v671_v26 = vpop.f32.mrb[31].mxu0 }
 0x13e   : > { %1137 = vst.msk [vmem:[%s1669_s22 + $0x6c] sm:$0xf] %vm1109_vm4, %v1389_v9  ;;  %v891_v18 = vld [vmem:[#allocation2 + $0x68] sm:$0xff]  ;;  %v977_v23 = vmax.f32 %v945_v15, 0.0  ;;  %v735_v27 = vpop.f32.mrb[31].mxu1 }
 0x13f   : > { %v907_v19 = vld [vmem:[#allocation2 + $0xe8] sm:$0xff]  ;;  %v930_v24 = vadd.f32 %v1655_v55, %v891_v18  ;;  %757 = vst.msk [vmem:[#allocation2 + $0x78] sm:$0xff] %vm741_vm3, %v669_v20  ;;  %773 = vst.msk [vmem:[#allocation2 + $0xf8] sm:$0xff] %vm741_vm3, %v733_v21  ;;  %v1374_v28 = vpack.c.bf16 %v961_v22, %v961_v22 }
 0x140   : > { %v946_v25 = vadd.f32 %v1655_v55, %v907_v19  ;;  %v1390_v29 = vpack.c.bf16 %v977_v23, %v977_v23 }
 0x141   : > { %v962_v30 = vmax.f32 %v930_v24, 0.0  ;;  %1122 = vst.msk [vmem:[%s1669_s22 + $0x30] sm:$0xf] %vm1109_vm4, %v1374_v28 }
 0x142   : > { %v978_v31 = vmax.f32 %v946_v25, 0.0  ;;  %1138 = vst.msk [vmem:[%s1669_s22 + $0x70] sm:$0xf] %vm1109_vm4, %v1390_v29  ;;  %v892_v34 = vld [vmem:[#allocation2 + $0x70] sm:$0xff] }
 0x143   : > { %v1375_v32 = vpack.c.bf16 %v962_v30, %v962_v30  ;;  %v908_v35 = vld [vmem:[#allocation2 + $0xf0] sm:$0xff]  ;;  %v931_v36 = vadd.f32 %v1655_v55, %v892_v34 }
 0x144   : > { %v1391_v33 = vpack.c.bf16 %v978_v31, %v978_v31  ;;  %v947_v37 = vadd.f32 %v1655_v55, %v908_v35 }
 0x145   : > { %1123 = vst.msk [vmem:[%s1669_s22 + $0x34] sm:$0xf] %vm1109_vm4, %v1375_v32  ;;  %v963_v40 = vmax.f32 %v931_v36, 0.0 }
 0x146   : > { %1139 = vst.msk [vmem:[%s1669_s22 + $0x74] sm:$0xf] %vm1109_vm4, %v1391_v33  ;;  %v893_v38 = vld [vmem:[#allocation2 + $0x78] sm:$0xff]  ;;  %v979_v41 = vmax.f32 %v947_v37, 0.0 }
 0x147   : > { %v909_v39 = vld [vmem:[#allocation2 + $0xf8] sm:$0xff]  ;;  %v932_v42 = vadd.f32 %v1655_v55, %v893_v38  ;;  %v1376_v44 = vpack.c.bf16 %v963_v40, %v963_v40 }
 0x148   : > { %v948_v43 = vadd.f32 %v1655_v55, %v909_v39  ;;  %v1392_v45 = vpack.c.bf16 %v979_v41, %v979_v41 }
 0x149   : > { %v964_v46 = vmax.f32 %v932_v42, 0.0  ;;  %1124 = vst.msk [vmem:[%s1669_s22 + $0x38] sm:$0xf] %vm1109_vm4, %v1376_v44 }
 0x14a   : > { %v980_v47 = vmax.f32 %v948_v43, 0.0  ;;  %1140 = vst.msk [vmem:[%s1669_s22 + $0x78] sm:$0xf] %vm1109_vm4, %v1392_v45 }
 0x14b   : > { %v1377_v48 = vpack.c.bf16 %v964_v46, %v964_v46 }
 0x14c   : > { %v1393_v49 = vpack.c.bf16 %v980_v47, %v980_v47 }
 0x14d   : > { %1125 = vst.msk [vmem:[%s1669_s22 + $0x3c] sm:$0xf] %vm1109_vm4, %v1377_v48 }
 0x14e   : > { %1141 = vst.msk [vmem:[%s1669_s22 + $0x7c] sm:$0xf] %vm1109_vm4, %v1393_v49 }
 0x14f PF: > { %s13_s14 = sadd.s32 1, %s1520_s14   ;;  %s1800_s12 = smov %s1516_s13 }
 0x150   : > { %p10_p5 = scmp.ge.s32.totalorder %s13_s14, 4   ;;  %s1801_s13 = smov %s1803_s15 }
 0x152   :  { %12 = sbr.rel (!%p10_p5) target bundleno = 2 (0x2), region = 80 }

</bundles_post_ra>
